<compile_context>
chip_gen: v6e
topology: v6e:2x2x1
jax: 0.10.0
libtpu: 0.0.40
codegen_flags: <defaults>
</compile_context>

<pallas_src>
import jax
import jax.numpy as jnp
from jax.experimental import pallas as pl
from jax.experimental.pallas import tpu as pltpu


def _gcn_kernel(adj_ref, x_ref, w_ref, out_ref, acc_ref):
    k = pl.program_id(1)

    @pl.when(k == 0)
    def _():
        acc_ref[...] = jnp.zeros_like(acc_ref)

    # support tile: [block_k, out_f] = x[k-block] @ W   (W resident in VMEM)
    support = jnp.dot(x_ref[...], w_ref[...], preferred_element_type=jnp.float32)
    # accumulate: acc += adj[i-block, k-block] @ support
    acc_ref[...] += jnp.dot(adj_ref[...], support, preferred_element_type=jnp.float32)

    @pl.when(k == pl.num_programs(1) - 1)
    def _():
        # default GCNLayer activation is ReLU (bias=False path)
        out_ref[...] = jnp.maximum(acc_ref[...], 0.0).astype(out_ref.dtype)


def gcn_layer(adj, x, weights, *, block_i=128, block_k=128):
    """adj: [N, N]; x: [N, in_f]; weights: [in_f, out_f]. Returns (adj, output)."""
    N = adj.shape[0]
    assert adj.shape[0] == adj.shape[1], "GCN input error!"
    assert x.shape[0] == N
    in_f = x.shape[1]
    out_f = weights.shape[1]
    assert N % block_i == 0 and N % block_k == 0, "N must divide the block sizes"

    grid = (N // block_i, N // block_k)

    adj_spec = pl.BlockSpec((block_i, block_k), lambda i, k: (i, k))
    x_spec = pl.BlockSpec((block_k, in_f), lambda i, k: (k, 0))
    w_spec = pl.BlockSpec((in_f, out_f), lambda i, k: (0, 0))   # resident weight
    out_spec = pl.BlockSpec((block_i, out_f), lambda i, k: (i, 0))

    output = pl.pallas_call(
        _gcn_kernel,
        out_shape=jax.ShapeDtypeStruct((N, out_f), x.dtype),
        grid_spec=pltpu.PrefetchScalarGridSpec(
            num_scalar_prefetch=0,
            grid=grid,
            in_specs=[adj_spec, x_spec, w_spec],
            out_specs=out_spec,
            scratch_shapes=[pltpu.VMEM((block_i, out_f), jnp.float32)],
        ),
        compiler_params=pltpu.CompilerParams(
            dimension_semantics=("parallel", "arbitrary")),
    )(adj, x, weights)
    return adj, output


def init_gcn_params(key, input_features, output_features, dtype=jnp.float32):
    """Mimics GCNLayer.reset_parameters: uniform(-std, std), std = 1/sqrt(out_f)."""
    std = 1.0 / (output_features ** 0.5)
    w = jax.random.uniform(key, (input_features, output_features), dtype,
                           minval=-std, maxval=std)
    return w


if __name__ == "__main__":
    # Small but MXU/lane-aligned shapes: N=256 nodes, in_f=128, out_f=128.
    N, in_features, out_features = 256, 128, 128

    key = jax.random.PRNGKey(0)
    kadj, kx, kw = jax.random.split(key, 3)

    adj = jax.random.uniform(kadj, (N, N), jnp.float32)
    x = jax.random.normal(kx, (N, in_features), jnp.float32)
    weights = init_gcn_params(kw, in_features, out_features)

    adj_out, output = gcn_layer(adj, x, weights)
    jax.block_until_ready((adj_out, output))

    # Pure-JAX reference (force full-precision matmuls for the comparison).
    support_ref = jnp.dot(x, weights, precision=jax.lax.Precision.HIGHEST)
    out_ref = jnp.dot(adj, support_ref, precision=jax.lax.Precision.HIGHEST)
    out_ref = jnp.maximum(out_ref, 0.0)

    assert adj_out.shape == adj.shape
    assert jnp.allclose(output, out_ref, atol=1e-4, rtol=1e-4), (
        float(jnp.max(jnp.abs(output - out_ref))))

    print("KERNEL_OK")
</pallas_src>

<mosaic_0001>
module attributes {stable_mosaic.version = 11 : i64} {
  func.func @_gcn_kernel(%arg0: i32, %arg1: i32, %arg2: memref<128x128xf32, #tpu.memory_space<vmem>>, %arg3: memref<128x128xf32, #tpu.memory_space<vmem>>, %arg4: memref<128x128xf32, #tpu.memory_space<vmem>>, %arg5: memref<128x128xf32, #tpu.memory_space<vmem>>, %arg6: memref<128x128xf32, #tpu.memory_space<vmem>>) attributes {dimension_semantics = [#tpu.dimension_semantics<parallel>, #tpu.dimension_semantics<arbitrary>], iteration_bounds = array<i64: 2, 2>, scalar_prefetch = 0 : i64, scratch_operands = 1 : i64, tpu.core_type = #tpu.core_type<tc>, window_params = [{transform_indices = @transform_0, window_bounds = array<i64: 128, 128>}, {transform_indices = @transform_1, window_bounds = array<i64: 128, 128>}, {pipeline_mode = #tpu.pipeline_mode<synchronous>, transform_indices = @transform_2, window_bounds = array<i64: 128, 128>}, {transform_indices = @transform_3, window_bounds = array<i64: 128, 128>}]} {
    %c0_i32 = arith.constant 0 : i32
    %0 = arith.cmpi eq, %arg1, %c0_i32 : i32
    %1 = arith.extui %0 : i1 to i32
    %c0_i32_0 = arith.constant 0 : i32
    %2 = arith.cmpi ne, %1, %c0_i32_0 : i32
    scf.if %2 {
      %cst_12 = arith.constant 0.000000e+00 : f32
      %14 = vector.broadcast %cst_12 : f32 to vector<128x128xf32>
      %c0_13 = arith.constant 0 : index
      %c0_14 = arith.constant 0 : index
      %15 = vector.load %arg6[%c0_13, %c0_14] : memref<128x128xf32, #tpu.memory_space<vmem>>, vector<128x128xf32>
      tpu.vector_store %arg6[%c0_13, %c0_14], %14 {strides = array<i32>} : memref<128x128xf32, #tpu.memory_space<vmem>>, vector<128x128xf32>,
    } else {
    }
    %c0 = arith.constant 0 : index
    %c0_1 = arith.constant 0 : index
    %3 = vector.load %arg3[%c0, %c0_1] : memref<128x128xf32, #tpu.memory_space<vmem>>, vector<128x128xf32>
    %c0_2 = arith.constant 0 : index
    %c0_3 = arith.constant 0 : index
    %4 = vector.load %arg4[%c0_2, %c0_3] : memref<128x128xf32, #tpu.memory_space<vmem>>, vector<128x128xf32>
    %cst = arith.constant dense<0.000000e+00> : vector<128x128xf32>
    %5 = tpu.matmul %3, %4, %cst {dimension_numbers = #tpu.dot_dimension_numbers<[1], [0], [0], [1], [0, 0, 1, 1], [], []>} : vector<128x128xf32>, vector<128x128xf32>, vector<128x128xf32> -> vector<128x128xf32>
    %c0_4 = arith.constant 0 : index
    %c0_5 = arith.constant 0 : index
    %6 = vector.load %arg6[%c0_4, %c0_5] : memref<128x128xf32, #tpu.memory_space<vmem>>, vector<128x128xf32>
    %c0_6 = arith.constant 0 : index
    %c0_7 = arith.constant 0 : index
    %7 = vector.load %arg2[%c0_6, %c0_7] : memref<128x128xf32, #tpu.memory_space<vmem>>, vector<128x128xf32>
    %cst_8 = arith.constant dense<0.000000e+00> : vector<128x128xf32>
    %8 = tpu.matmul %7, %5, %cst_8 {dimension_numbers = #tpu.dot_dimension_numbers<[1], [0], [0], [1], [0, 0, 1, 1], [], []>} : vector<128x128xf32>, vector<128x128xf32>, vector<128x128xf32> -> vector<128x128xf32>
    %9 = arith.addf %6, %8 : vector<128x128xf32>
    %c0_9 = arith.constant 0 : index
    %c0_10 = arith.constant 0 : index
    %10 = vector.load %arg6[%c0_9, %c0_10] : memref<128x128xf32, #tpu.memory_space<vmem>>, vector<128x128xf32>
    tpu.vector_store %arg6[%c0_9, %c0_10], %9 {strides = array<i32>} : memref<128x128xf32, #tpu.memory_space<vmem>>, vector<128x128xf32>,
    %c1_i32 = arith.constant 1 : i32
    %11 = arith.cmpi eq, %arg1, %c1_i32 : i32
    %12 = arith.extui %11 : i1 to i32
    %c0_i32_11 = arith.constant 0 : i32
    %13 = arith.cmpi ne, %12, %c0_i32_11 : i32
    scf.if %13 {
      %c0_12 = arith.constant 0 : index
      %c0_13 = arith.constant 0 : index
      %14 = vector.load %arg6[%c0_12, %c0_13] : memref<128x128xf32, #tpu.memory_space<vmem>>, vector<128x128xf32>
      %cst_14 = arith.constant 0.000000e+00 : f32
      %15 = vector.broadcast %cst_14 : f32 to vector<128x128xf32>
      %16 = arith.maximumf %14, %15 : vector<128x128xf32>
      %c0_15 = arith.constant 0 : index
      %c0_16 = arith.constant 0 : index
      %17 = vector.load %arg5[%c0_15, %c0_16] : memref<128x128xf32, #tpu.memory_space<vmem>>, vector<128x128xf32>
      tpu.vector_store %arg5[%c0_15, %c0_16], %16 {strides = array<i32>} : memref<128x128xf32, #tpu.memory_space<vmem>>, vector<128x128xf32>,
    } else {
    }
    return
  }
  func.func @transform_0(%arg0: i32, %arg1: i32) -> (i32, i32) {
    %c0_i32 = arith.constant 0 : i32
    return %arg0, %arg1 : i32, i32
  }
  func.func @transform_1(%arg0: i32, %arg1: i32) -> (i32, i32) {
    %c0_i32 = arith.constant 0 : i32
    %c0_i32_0 = arith.constant 0 : i32
    return %arg1, %c0_i32 : i32, i32
  }
  func.func @transform_2(%arg0: i32, %arg1: i32) -> (i32, i32) {
    %c0_i32 = arith.constant 0 : i32
    %c0_i32_0 = arith.constant 0 : i32
    %c0_i32_1 = arith.constant 0 : i32
    return %c0_i32, %c0_i32_0 : i32, i32
  }
  func.func @transform_3(%arg0: i32, %arg1: i32) -> (i32, i32) {
    %c0_i32 = arith.constant 0 : i32
    %c0_i32_0 = arith.constant 0 : i32
    return %arg0, %c0_i32 : i32, i32
  }
}

</mosaic_0001>

<bundles_post_ra>
// kernel: tpu_custom_call.1
= control target key start
LH: loop header
LB: loop body
LE: loop exit
PB: predicated region body
PF: predicated region fallthrough
CT: control target
= control target key end

     0   :  { %s1831_s0 = inlined_call_operand.hbm [shape: f32[256,256], index: 0, kind: input, shape index: {}]   ;;  %s1832_s1 = inlined_call_operand.hbm [shape: f32[256,128], index: 1, kind: input, shape index: {}]   ;;  %s1833_s2 = inlined_call_operand.hbm [shape: f32[128,128], index: 2, kind: input, shape index: {}]   ;;  %s1834_s3 = inlined_call_operand.hbm [shape: f32[256,128], index: 3, kind: output, shape index: {}]  }
   0x1   :  { %1854 = sst [smem:[#allocation23_spill]] %s1833_s2 }
   0x2   :  { %1855 = sst [smem:[#allocation24_spill]] %s1834_s3 }
   0x3   :  { %8 = vsyncpa [#allocation4], 0 }
   0x4   :  { %10 = vsyncpa [#allocation4 + $0x1], 0 }
   0x5   :  { %11 = vsyncpa [#allocation7], 0 }
   0x6   :  { %13 = vsyncpa [#allocation7 + $0x1], 0 }
   0x7   :  { %14 = vsyncpa [#allocation5], 0 }
   0x8   :  { %16 = vsyncpa [#allocation5 + $0x1], 0  ;;  %s1469_s12 = smov 0   ;;  %s1471_s13 = smov 0  }
   0x9   :  { %s1473_s14 = smov 0   ;;  %s1475_s15 = smov 0  }
   0xa   :  { %s1477_s16 = smov 0   ;;  %s1479_s17 = smov 0  }
   0xb   :  { %s1481_s18 = smov 0   ;;  %s1483_s19 = smov 0  }
   0xc   :  { %s1485_s20 = smov 0   ;;  %s1487_s21 = smov 0  }
   0xd   :  { %s1489_s22 = smov 0   ;;  %s1491_s23 = smov 0  }
   0xe   :  { %s1493_s24 = smov 0   ;;  %s1495_s25 = smov 0  }
   0xf LB: > { %1856 = sst [smem:[#allocation14_spill]] %s1385_s12  ;;  %s1536_s26 = sadd.s32 4294967295, %s1437_s25   ;;  %s1437_s25 = sphi %s1495_s25, %s22_s25   ;;  %s1433_s24 = sphi %s1493_s24, %s1912_s24   ;;  %s1429_s23 = sphi %s1491_s23, %s1911_s23   ;;  %s1425_s22 = sphi %s1489_s22, %s1910_s22   ;;  %s1421_s21 = sphi %s1487_s21, %s1909_s21   ;;  %s1417_s20 = sphi %s1485_s20, %s1908_s20   ;;  %s1413_s19 = sphi %s1483_s19, %s1907_s19   ;;  %s1409_s18 = sphi %s1481_s18, %s1906_s18   ;;  %s1405_s17 = sphi %s1479_s17, %s1905_s17   ;;  %s1401_s16 = sphi %s1477_s16, %s1904_s16   ;;  %s1397_s15 = sphi %s1475_s15, %s1903_s15   ;;  %s1393_s14 = sphi %s1473_s14, %s1902_s14   ;;  %s1389_s13 = sphi %s1471_s13, %s1901_s13   ;;  %s1385_s12 = sphi %s1469_s12, %s1900_s12  }
  0x10   : > { %1857 = sst [smem:[#allocation15_spill]] %s1389_s13  ;;  %s853_s27 = sadd.s32 4294967294, %s1437_s25  }
  0x11   : > { %1858 = sst [smem:[#allocation16_spill]] %s1421_s21  ;;  %p56_p0 = scmp.ne.s32.totalorder %s1413_s19, %s1409_s18 }
  0x12   : > { %1859 = sst [smem:[#allocation17_spill]] %s1425_s22  ;;  %p1853_p1 = scmp.eq.s32.totalorder %s1536_s26, 0 }
  0x13   : > { %1860 = sst [smem:[#allocation18_spill]] %s1536_s26  ;;  %p82_p2 = scmp.ne.s32.totalorder %s1401_s16, %s1397_s15 }
  0x14   : > { %p1545_p3 = por %p1853_p1, %p56_p0  ;;  %p126_p4 = scmp.ne.s32.totalorder %s1393_s14, %s1389_s13 }
  0x15   : > { %p1553_p5 = por %p82_p2, %p1853_p1  ;;  %p127_p6 = scmp.eq.s32.totalorder %s1536_s26, 3 }
  0x16   : > { %p132_p7 = scmp.ne.s32.totalorder %s1389_s13, %s1385_s12  ;;  %p133_p8 = scmp.eq.s32.totalorder %s853_s27, 3 }
  0x17   : > { %s1862_s30 = scalar_select %p1553_p5, 1, 0 }
  0x18   : > { %p1560_p9 = por %p127_p6, %p126_p4  ;;  %p854_p10 = scmp.ge.s32.totalorder %s1437_s25, 1 }
  0x19   : > { %1863 = sst [smem:[#allocation19_spill]] %s1862_s30  ;;  %p1565_p11 = por %p133_p8, %p132_p7 }
  0x1a   : > { %s1864_s4 = scalar_select %p1560_p9, 1, 0 }
  0x1b   : > { %s1866_s5 = scalar_select %p1565_p11, 1, 0 }
  0x1c   : > { %1865 = sst [smem:[#allocation20_spill]] %s1864_s4  ;;  %p140_p12 = scmp.lt.s32.totalorder %s1437_s25, 5 }
  0x1d   : > { %1867 = sst [smem:[#allocation21_spill]] %s1866_s5  ;;  %s1439_s7 = smov [#allocation8]  }
  0x1e   : > { %p1570_p13 = pnand %p854_p10, %p140_p12  ;;  %s152_s8 = sshll.u32 %s1439_s7, 4  ;;  %s153_s8 = int_to_ptr.vmem [resolvable:$true] %s152_s8 }
  0x1f   : > { %s1214_s9 = scalar_lea.vmem %s153_s8, 2048  ;;  %p1222_p9 = scmp.lt.s32.totalorder %s153_s8, %s153_s8 }
  0x20   : > { %p1065_p0 = pneg %p1570_p13  ;;  %p1215_p6 = scmp.ne.s32.totalorder %s153_s8, %s1214_s9 }
  0x21   : > { %p1223_p11 = scmp.lt.s32.totalorder %s1214_s9, %s1214_s9 }
  0x22   : > { %p1066_p2 = pnand %p1065_p0, %p1853_p1 }
  0x23   : > { %p1224_p5 = por %p1223_p11, %p1222_p9 }
  0x24   : > { %p1205_p4 = pneg %p1066_p2 }
  0x26   : > { %p1217_p7 = pnand %p1215_p6, %p1205_p4 }
  0x28   : > { %p1218_p8 = pneg %p1217_p7 }
  0x2a   : > { %p1225_p10 = pnand %p1224_p5, %p1218_p8 }
  0x2c   : > { %1228 = shalt.err (!%p1225_p10)
}
  0x2d   : > { %s1837_s10 = smov 128   ;;  %s1839_s11 = smov 8  }
  0x2e   : > { %s1869_s2 = sld [smem:[#allocation23_spill]]  ;;  %s31_s27 = sadd.s32 1, %s1429_s23 }
  0x2f   : > { %p32_p5 = scmp.ge.s32.totalorder %s31_s27, 2  ;;  %s34_s7 = sadd.s32 1, %s1433_s24 }
  0x30   : > { %s43_s9 = sadd.s32 1, %s1417_s20  ;;  %p50_p9 = scmp.ne.s32.totalorder %s1417_s20, %s1413_s19 }
  0x31   : > { %s1914_s27 = smov (%p32_p5, %s31_s27), 0  ;;  %s1916_s7 = smov (!%p32_p5, %s34_s7), %s1433_s24 }
  0x32   : > { %1870 = sst [smem:[#allocation22_spill]] %s1914_s27  ;;  %s1594_s28 = ssub.s32 %s1429_s23, %s1914_s27 }
  0x33   : > { %p51_p11 = scmp.eq.s32.totalorder %s1437_s25, 0  ;;  %p36_p12 = scmp.ge.s32.totalorder %s1916_s7, 2 }
  0x34   : > { %1068 = dma.hbm_to_vmem [thread:$0]  (!%p1066_p2), %s1869_s2, 2048, %s153_s8, [#allocation7], %s1837_s10, %s1837_s10, %s1839_s11  }
  0x35   : > { %p67_p0 = scmp.eq.s32.totalorder %s1594_s28, 0  ;;  %p1600_p2 = por %p51_p11, %p50_p9 }
  0x36   : > { %p1081_p4 = scmp.lt.s32.totalorder %s1437_s25, 4  ;;  %s1918_s7 = smov (%p36_p12, %s1916_s7), 0 }
  0x37   : > { %s166_s15 = sand.u32 1, %s1417_s20   ;;  %s876_s18 = sshll.u32 %s1433_s24, 5 }
  0x38   : > { %s38_s10 = ssub.s32 %s1433_s24, %s1918_s7  ;;  %s857_s2 = sshll.u32 %s166_s15, 7 }
  0x39   : > { %s40_s11 = sor.u32 %s1594_s28, %s38_s10  ;;  %p114_p6 = scmp.eq.s32.totalorder %s38_s10, 0 }
  0x3a   : > { %p41_p7 = scmp.eq.s32.totalorder %s40_s11, 0  ;;  %s1872_s27 = sadd.s32 1, %s1393_s14 }
  0x3b   : > { %s1615_s5 = scalar_select %p114_p6, %s1393_s14, %s1872_s27  }
  0x3c   : > { %s1618_s12 = scalar_select %p41_p7, %s1417_s20, %s43_s9  }
  0x3d   : > { %s176_s3 = sadd.s32 %s1429_s23, %s876_s18  ;;  %s170_s22 = scalar_lea.vmem [#allocation3], %s857_s2 }
  0x3e   : > { %s860_s4 = sshll.u32 %s176_s3, 7  ;;  %s179_s21 = sshll.u32 %s170_s22, 4  ;;  %s180_s21 = int_to_ptr.vmem [resolvable:$true] %s179_s21 }
  0x3f   : > { %s178_s26 = scalar_lea.hbm %s1831_s0, %s860_s4  ;;  %p1628_p8 = pnand %p1081_p4, %p1600_p2 }
  0x40   : > { %s167_s27 = scalar_lea.sflag [#allocation4], %s166_s15  ;;  %s1242_s9 = scalar_lea.vmem %s180_s21, 2048 }
  0x41   : > { %p1231_p10 = pneg %p1628_p8  ;;  %p1243_p5 = scmp.ne.s32.totalorder %s180_s21, %s1242_s9 }
  0x42   : > { %s1442_s2 = smov [#allocation3]  }
  0x43   : > { %p1245_p9 = pnand %p1243_p5, %p1231_p10  ;;  %s1247_s3 = sshll.u32 %s1442_s2, 4  ;;  %s1248_s3 = int_to_ptr.vmem [resolvable:$false] %s1247_s3 }
  0x44   : > { %s1249_s13 = scalar_lea.vmem %s1248_s3, 4096  ;;  %p1250_p6 = scmp.lt.s32.totalorder %s180_s21, %s1248_s3 }
  0x45   : > { %p1246_p12 = pneg %p1245_p9  ;;  %p1251_p7 = scmp.lt.s32.totalorder %s1249_s13, %s1242_s9 }
  0x47   : > { %p1252_p1 = por %p1251_p7, %p1250_p6 }
  0x49   : > { %p1253_p2 = pnand %p1252_p1, %p1246_p12 }
  0x4b   : > { %1256 = shalt.err (!%p1253_p2)
}
  0x4c   : > { %s1443_s22 = smov 256   ;;  %s1874_s30 = smov 8  }
  0x4d   : > { %s1875_s4 = smov 128   ;;  %s69_s8 = sadd.s32 1, %s1405_s17 }
  0x4e   : > { %1072 = dma.hbm_to_vmem [thread:$0]  (!%p1628_p8), %s178_s26, 2048, %s180_s21, %s167_s27, %s1443_s22, %s1875_s4, %s1874_s30  }
  0x4f   : > { %p76_p10 = scmp.ne.s32.totalorder %s1405_s17, %s1401_s16  ;;  %s191_s18 = sand.u32 1, %s1405_s17  }
  0x50   : > { %s1645_s15 = scalar_select %p67_p0, %s1405_s17, %s69_s8  }
  0x51   : > { %p78_p1 = por %p76_p10, %p51_p11  ;;  %s877_s10 = sshll.u32 %s1429_s23, 11 }
  0x52   : > { %s861_s9 = sshll.u32 %s191_s18, 7  ;;  %s199_s13 = scalar_lea.hbm %s1832_s1, %s877_s10 }
  0x53   : > { %p1656_p5 = pnand %p1081_p4, %p78_p1  ;;  %s193_s21 = scalar_lea.vmem [#allocation6], %s861_s9 }
  0x54   : > { %s200_s26 = sshll.u32 %s193_s21, 4  ;;  %s1877_s28 = sand.u32 1, %s1437_s25   ;;  %s201_s26 = int_to_ptr.vmem [resolvable:$true] %s200_s26 }
  0x55   : > { %s190_s27 = scalar_lea.sflag [#allocation7], %s1877_s28  ;;  %p1259_p11 = pneg %p1656_p5 }
  0x56   : > { %s1270_s22 = scalar_lea.vmem %s201_s26, 2048  ;;  %s1444_s8 = smov [#allocation6]  }
  0x57   : > { %p1271_p0 = scmp.ne.s32.totalorder %s201_s26, %s1270_s22  ;;  %s1275_s18 = sshll.u32 %s1444_s8, 4  ;;  %s1276_s18 = int_to_ptr.vmem [resolvable:$false] %s1275_s18 }
  0x58   : > { %s1277_s10 = scalar_lea.vmem %s1276_s18, 4096  ;;  %p1278_p4 = scmp.lt.s32.totalorder %s201_s26, %s1276_s18 }
  0x59   : > { %p1273_p8 = pnand %p1271_p0, %p1259_p11  ;;  %p1279_p12 = scmp.lt.s32.totalorder %s1277_s10, %s1270_s22 }
  0x5b   : > { %p1274_p9 = pneg %p1273_p8  ;;  %p1280_p6 = por %p1279_p12, %p1278_p4 }
  0x5d   : > { %p1281_p7 = pnand %p1280_p6, %p1274_p9 }
  0x5f   : > { %1284 = shalt.err (!%p1281_p7)
}
  0x60   : > { %1075 = dma.hbm_to_vmem [thread:$0]  (!%p1656_p5), %s199_s13, 2048, %s201_s26, %s190_s27, %s1875_s4, %s1875_s4, %s1874_s30  }
  0x61   : > { %212 = sbr.rel (%p1570_p13) target bundleno = 690 (0x2b2), region = 32  ;;  %s214_s9 = sand.u32 (!%p1570_p13), 1, %s1413_s19  }
  0x62   : > { %s865_s2 = sshll.u32 (!%p1570_p13), %s214_s9, 7  ;;  %s215_s3 = scalar_lea.sflag (!%p1570_p13), [#allocation4], %s214_s9 }
  0x63   : > { %s1672_s21 = scalar_lea.vmem (!%p1570_p13), [#allocation3], %s865_s2 }
  0x66   : > { %1368 = dma.done.wait (%p1545_p3), %s215_s3, 2048  }
  0x67   : > { %1370 = vsyncadd (%p1545_p3), %s215_s3, 4294965248  ;;  %s1878_s11 = sld [smem:[#allocation18_spill]]  ;;  %s225_s30 = sand.u32 1, %s1401_s16  }
  0x68   : > { %s1879_s28 = sld [smem:[#allocation19_spill]]  ;;  %s866_s4 = sshll.u32 %s225_s30, 7 }
  0x69   : > { %s1680_s13 = scalar_lea.vmem [#allocation6], %s866_s4 }
  0x6d   : > { %s223_s22 = sand.u32 1, %s1878_s11  }
  0x6e   : > { %s224_s6 = scalar_lea.sflag [#allocation7], %s223_s22  ;;  %p1880_p13 = scmp.ne.s32.totalorder %s1879_s28, 0 }
  0x70   : > { %1372 = dma.done.wait (%p1880_p13), %s224_s6, 2048  }
  0x71   : > { %1374 = vsyncadd (%p1880_p13), %s224_s6, 4294965248  ;;  %p1881_p2 = scmp.eq.s32.totalorder %s1878_s11, 0 }
  0x73   : > { %1376 = dma.done.wait (%p1881_p2), [#allocation7], 2048   ;;  %p1882_p10 = pmov %p1881_p2 }
  0x74   : > { %s1883_s29 = sld [smem:[#allocation15_spill]] }
  0x75   : > { %1378 = vsyncadd (%p1882_p10), [#allocation7], 4294965248  ;;  %s1884_s18 = sld [smem:[#allocation16_spill]] }
  0x7a   : > { %s256_s26 = sand.u32 1, %s1883_s29  }
  0x7b   : > { %s868_s27 = sshll.u32 %s256_s26, 7  ;;  %p869_p3 = scmp.ne.s32.totalorder %s1884_s18, 0 }
  0x7c   : > { %s1693_s8 = scalar_lea.vmem [#allocation9], %s868_s27 }
  0x7d   : > { %265 = sbr.rel (%p869_p3) target bundleno = 139 (0x8b), region = 48 }
  0x82   : > { %v1445_v0 = vmov 0.0  }
  0x83   : > { %266 = vst [vmem:[#allocation2 + $0x30] sm:$0xff] %v1445_v0  ;;  %267 = vst [vmem:[#allocation2] sm:$0xff] %v1445_v0 }
  0x84   : > { %268 = vst [vmem:[#allocation2 + $0x58] sm:$0xff] %v1445_v0  ;;  %269 = vst [vmem:[#allocation2 + $0x18] sm:$0xff] %v1445_v0 }
  0x85   : > { %270 = vst [vmem:[#allocation2 + $0x50] sm:$0xff] %v1445_v0  ;;  %271 = vst [vmem:[#allocation2 + $0x68] sm:$0xff] %v1445_v0 }
  0x86   : > { %272 = vst [vmem:[#allocation2 + $0x8] sm:$0xff] %v1445_v0  ;;  %273 = vst [vmem:[#allocation2 + $0x48] sm:$0xff] %v1445_v0 }
  0x87   : > { %274 = vst [vmem:[#allocation2 + $0x40] sm:$0xff] %v1445_v0  ;;  %275 = vst [vmem:[#allocation2 + $0x20] sm:$0xff] %v1445_v0 }
  0x88   : > { %276 = vst [vmem:[#allocation2 + $0x10] sm:$0xff] %v1445_v0  ;;  %277 = vst [vmem:[#allocation2 + $0x38] sm:$0xff] %v1445_v0 }
  0x89   : > { %278 = vst [vmem:[#allocation2 + $0x60] sm:$0xff] %v1445_v0  ;;  %279 = vst [vmem:[#allocation2 + $0x70] sm:$0xff] %v1445_v0 }
  0x8a   : > { %280 = vst [vmem:[#allocation2 + $0x78] sm:$0xff] %v1445_v0  ;;  %281 = vst [vmem:[#allocation2 + $0x28] sm:$0xff] %v1445_v0 }
  0x8b PF: > { %v313_v1 = vld [vmem:[#allocation8 + $0x78] sm:$0xff]  ;;  %v312_v2 = vld [vmem:[#allocation8 + $0x70] sm:$0xff]  ;;  %v311_v3 = vld [vmem:[#allocation8 + $0x68] sm:$0xff]  ;;  %s1885_s10 = sld [smem:[#allocation16_spill]] }
  0x8c   : > { %943 = vmatprep.subr.mxu0 %v313_v1  ;;  %v310_v4 = vld [vmem:[#allocation8 + $0x60] sm:$0xff]  ;;  %v309_v6 = vld [vmem:[#allocation8 + $0x58] sm:$0xff]  ;;  %v308_v7 = vld [vmem:[#allocation8 + $0x50] sm:$0xff] }
  0x8d   : > { %944 = vmatpush3.msra.mxu0 %v313_v1  ;;  %v282_v5 = vld [vmem:[%s1680_s13] sm:$0xff]  ;;  %v307_v8 = vld [vmem:[#allocation8 + $0x48] sm:$0xff]  ;;  %v305_v10 = vld [vmem:[#allocation8 + $0x38] sm:$0xff] }
  0x8e   : > { %945 = vmatprep.subr.mxu0 %v312_v2  ;;  %975 = vmatprep.mubr.f32.mxu0 %v282_v5  ;;  %v306_v9 = vld [vmem:[#allocation8 + $0x40] sm:$0xff]  ;;  %v304_v11 = vld [vmem:[#allocation8 + $0x30] sm:$0xff]  ;;  %v303_v12 = vld [vmem:[#allocation8 + $0x28] sm:$0xff] }
  0x8f   : > { %946 = vmatpush3.msra.mxu0 %v312_v2  ;;  %v302_v13 = vld [vmem:[#allocation8 + $0x20] sm:$0xff]  ;;  %v301_v14 = vld [vmem:[#allocation8 + $0x18] sm:$0xff]  ;;  %v300_v15 = vld [vmem:[#allocation8 + $0x10] sm:$0xff] }
  0x90   : > { %947 = vmatprep.subr.mxu0 %v311_v3  ;;  %v299_v16 = vld [vmem:[#allocation8 + $0x8] sm:$0xff]  ;;  %v298_v17 = vld [vmem:[#allocation8] sm:$0xff]  ;;  %v284_v19 = vld [vmem:[%s1680_s13 + $0x10] sm:$0xff] }
  0x91   : > { %948 = vmatpush3.msra.mxu0 %v311_v3  ;;  %v283_v18 = vld [vmem:[%s1680_s13 + $0x8] sm:$0xff]  ;;  %v285_v20 = vld [vmem:[%s1680_s13 + $0x18] sm:$0xff]  ;;  %v286_v21 = vld [vmem:[%s1680_s13 + $0x20] sm:$0xff]  ;;  %p870_p1 = scmp.ne.s32.totalorder %s1885_s10, 1 }
  0x92   : > { %949 = vmatprep.subr.mxu0 %v310_v4  ;;  %v287_v22 = vld [vmem:[%s1680_s13 + $0x28] sm:$0xff]  ;;  %v288_v23 = vld [vmem:[%s1680_s13 + $0x30] sm:$0xff]  ;;  %v289_v24 = vld [vmem:[%s1680_s13 + $0x38] sm:$0xff] }
  0x93   : > { %950 = vmatpush3.msra.mxu0 %v310_v4  ;;  %v290_v25 = vld [vmem:[%s1680_s13 + $0x40] sm:$0xff]  ;;  %v291_v26 = vld [vmem:[%s1680_s13 + $0x48] sm:$0xff]  ;;  %v292_v27 = vld [vmem:[%s1680_s13 + $0x50] sm:$0xff] }
  0x94   : > { %951 = vmatprep.subr.mxu0 %v309_v6  ;;  %v293_v28 = vld [vmem:[%s1680_s13 + $0x58] sm:$0xff]  ;;  %v294_v29 = vld [vmem:[%s1680_s13 + $0x60] sm:$0xff]  ;;  %v295_v30 = vld [vmem:[%s1680_s13 + $0x68] sm:$0xff] }
  0x95   : > { %952 = vmatpush3.msra.mxu0 %v309_v6  ;;  %v296_v31 = vld [vmem:[%s1680_s13 + $0x70] sm:$0xff]  ;;  %v297_v32 = vld [vmem:[%s1680_s13 + $0x78] sm:$0xff]  ;;  %v475_v33 = vld [vmem:[%s1672_s21] sm:$0xff] }
  0x96   : > { %953 = vmatprep.subr.mxu0 %v308_v7  ;;  %1031 = vmatprep.mubr.f32.mxu1 %v475_v33  ;;  %v476_v50 = vld [vmem:[%s1672_s21 + $0x8] sm:$0xff]  ;;  %v477_v51 = vld [vmem:[%s1672_s21 + $0x10] sm:$0xff]  ;;  %v478_v52 = vld [vmem:[%s1672_s21 + $0x18] sm:$0xff] }
  0x97   : > { %954 = vmatpush3.msra.mxu0 %v308_v7  ;;  %v479_v53 = vld [vmem:[%s1672_s21 + $0x20] sm:$0xff]  ;;  %v480_v54 = vld [vmem:[%s1672_s21 + $0x28] sm:$0xff]  ;;  %v481_v55 = vld [vmem:[%s1672_s21 + $0x30] sm:$0xff] }
  0x98   : > { %955 = vmatprep.subr.mxu0 %v307_v8  ;;  %v482_v56 = vld [vmem:[%s1672_s21 + $0x38] sm:$0xff]  ;;  %v483_v57 = vld [vmem:[%s1672_s21 + $0x40] sm:$0xff]  ;;  %v484_v58 = vld [vmem:[%s1672_s21 + $0x48] sm:$0xff] }
  0x99   : > { %956 = vmatpush3.msra.mxu0 %v307_v8  ;;  %v485_v59 = vld [vmem:[%s1672_s21 + $0x50] sm:$0xff]  ;;  %v486_v60 = vld [vmem:[%s1672_s21 + $0x58] sm:$0xff]  ;;  %v487_v61 = vld [vmem:[%s1672_s21 + $0x60] sm:$0xff] }
  0x9a   : > { %957 = vmatprep.subr.mxu0 %v306_v9  ;;  %v488_v62 = vld [vmem:[%s1672_s21 + $0x68] sm:$0xff]  ;;  %v489_v63 = vld [vmem:[%s1672_s21 + $0x70] sm:$0xff]  ;;  %v490_v0 = vld [vmem:[%s1672_s21 + $0x78] sm:$0xff] }
  0x9b   : > { %958 = vmatpush3.msra.mxu0 %v306_v9  ;;  %v460_v1 = vld [vmem:[#allocation2] sm:$0xff]  ;;  %v459_v3 = vld [vmem:[#allocation2 + $0x30] sm:$0xff]  ;;  %v462_v6 = vld [vmem:[#allocation2 + $0x18] sm:$0xff] }
  0x9c   : > { %959 = vmatprep.subr.mxu0 %v305_v10  ;;  %v461_v9 = vld [vmem:[#allocation2 + $0x58] sm:$0xff]  ;;  %v469_v33 = vld [vmem:[#allocation2 + $0x10] sm:$0xff] }
  0x9d   : > { %960 = vmatpush3.msra.mxu0 %v305_v10 }
  0x9e   : > { %961 = vmatprep.subr.mxu0 %v304_v11 }
  0x9f   : > { %962 = vmatpush3.msra.mxu0 %v304_v11 }
  0xa0   : > { %963 = vmatprep.subr.mxu0 %v303_v12 }
  0xa1   : > { %964 = vmatpush3.msra.mxu0 %v303_v12  ;;  %v464_v12 = vld [vmem:[#allocation2 + $0x68] sm:$0xff] }
  0xa2   : > { %965 = vmatprep.subr.mxu0 %v302_v13 }
  0xa3   : > { %966 = vmatpush3.msra.mxu0 %v302_v13 }
  0xa4   : > { %967 = vmatprep.subr.mxu0 %v301_v14 }
  0xa5   : > { %968 = vmatpush3.msra.mxu0 %v301_v14 }
  0xa6   : > { %969 = vmatprep.subr.mxu0 %v300_v15 }
  0xa7   : > { %970 = vmatpush3.msra.mxu0 %v300_v15  ;;  %v463_v15 = vld [vmem:[#allocation2 + $0x50] sm:$0xff] }
  0xa8   : > { %971 = vmatprep.subr.mxu0 %v299_v16 }
  0xa9   : > { %972 = vmatpush3.msra.mxu0 %v299_v16 }
  0xaa   : > { %973 = vmatprep.subr.mxu0 %v298_v17 }
  0xab   : > { %974 = vmatpush3.msra.mxu0 %v298_v17 }
  0xac   : > { %976 = vmatmul.mubr.f32.vlgmr.msra.gmra.mxu0 %v283_v18  ;;  %v466_v18 = vld [vmem:[#allocation2 + $0x48] sm:$0xff] }
  0xad   : > { %978 = vmatprep.mubr.f32.mxu0 %v284_v19 }
  0xb0   : > { %979 = vmatmul.mubr.f32.gmra.mxu0 %v285_v20 }
  0xb1   : > { %981 = vmatprep.mubr.f32.mxu0 %v286_v21  ;;  %v465_v21 = vld [vmem:[#allocation2 + $0x8] sm:$0xff] }
  0xb4   : > { %982 = vmatmul.mubr.f32.gmra.mxu0 %v287_v22 }
  0xb5   : > { %984 = vmatprep.mubr.f32.mxu0 %v288_v23 }
  0xb8   : > { %985 = vmatmul.mubr.f32.gmra.mxu0 %v289_v24  ;;  %v468_v24 = vld [vmem:[#allocation2 + $0x20] sm:$0xff] }
  0xb9   : > { %987 = vmatprep.mubr.f32.mxu0 %v290_v25 }
  0xbc   : > { %988 = vmatmul.mubr.f32.gmra.mxu0 %v291_v26 }
  0xbd   : > { %990 = vmatprep.mubr.f32.mxu0 %v292_v27  ;;  %v467_v27 = vld [vmem:[#allocation2 + $0x40] sm:$0xff] }
  0xc0   : > { %991 = vmatmul.mubr.f32.gmra.mxu0 %v293_v28 }
  0xc1   : > { %993 = vmatprep.mubr.f32.mxu0 %v294_v29 }
  0xc4   : > { %994 = vmatmul.mubr.f32.gmra.mxu0 %v295_v30  ;;  %v470_v30 = vld [vmem:[#allocation2 + $0x38] sm:$0xff] }
  0xc5   : > { %996 = vmatprep.mubr.f32.mxu0 %v296_v31 }
  0xc8   : > { %997 = vmatmul.mubr.f32.gmra.mxu0 %v297_v32 }
 0x16c   : > { %v977_v34 = vpop.f32.mrf.mxu0 }
 0x16e   : > { %v380_v35 = vpop.f32.mrf.mxu0 }
 0x170   : > { %v980_v36 = vpop.f32.mrf.mxu0 }
 0x172   : > { %v390_v37 = vpop.f32.mrf.mxu0 }
 0x174   : > { %v983_v38 = vpop.f32.mrf.mxu0 }
 0x176   : > { %v400_v39 = vpop.f32.mrf.mxu0 }
 0x178   : > { %v986_v40 = vpop.f32.mrf.mxu0 }
 0x17a   : > { %v410_v41 = vpop.f32.mrf.mxu0 }
 0x17c   : > { %v989_v42 = vpop.f32.mrf.mxu0 }
 0x17e   : > { %v420_v43 = vpop.f32.mrf.mxu0 }
 0x180   : > { %v992_v44 = vpop.f32.mrf.mxu0 }
 0x182   : > { %v430_v45 = vpop.f32.mrf.mxu0 }
 0x184   : > { %v995_v46 = vpop.f32.mrf.mxu0 }
 0x186   : > { %v440_v47 = vpop.f32.mrf.mxu0 }
 0x188   : > { %v998_v48 = vpop.f32.mrf.mxu0 }
 0x189   : > { %999 = vmatprep.subr.mxu1 %v998_v48 }
 0x18a   : > { %v450_v49 = vpop.f32.mrf.mxu0  ;;  %1000 = vmatpush3.msra.mxu1 %v998_v48 }
 0x18b   : > { %1001 = vmatprep.subr.mxu1 %v450_v49 }
 0x18c   : > { %1002 = vmatpush3.msra.mxu1 %v450_v49 }
 0x18d   : > { %1003 = vmatprep.subr.mxu1 %v995_v46 }
 0x18e   : > { %1004 = vmatpush3.msra.mxu1 %v995_v46 }
 0x18f   : > { %1005 = vmatprep.subr.mxu1 %v440_v47 }
 0x190   : > { %1006 = vmatpush3.msra.mxu1 %v440_v47 }
 0x191   : > { %1007 = vmatprep.subr.mxu1 %v992_v44 }
 0x192   : > { %1008 = vmatpush3.msra.mxu1 %v992_v44 }
 0x193   : > { %1009 = vmatprep.subr.mxu1 %v430_v45 }
 0x194   : > { %1010 = vmatpush3.msra.mxu1 %v430_v45  ;;  %v473_v45 = vld [vmem:[#allocation2 + $0x78] sm:$0xff] }
 0x195   : > { %1011 = vmatprep.subr.mxu1 %v989_v42 }
 0x196   : > { %1012 = vmatpush3.msra.mxu1 %v989_v42  ;;  %v474_v42 = vld [vmem:[#allocation2 + $0x28] sm:$0xff] }
 0x197   : > { %1013 = vmatprep.subr.mxu1 %v420_v43 }
 0x198   : > { %1014 = vmatpush3.msra.mxu1 %v420_v43 }
 0x199   : > { %1015 = vmatprep.subr.mxu1 %v986_v40 }
 0x19a   : > { %1016 = vmatpush3.msra.mxu1 %v986_v40 }
 0x19b   : > { %1017 = vmatprep.subr.mxu1 %v410_v41 }
 0x19c   : > { %1018 = vmatpush3.msra.mxu1 %v410_v41 }
 0x19d   : > { %1019 = vmatprep.subr.mxu1 %v983_v38 }
 0x19e   : > { %1020 = vmatpush3.msra.mxu1 %v983_v38 }
 0x19f   : > { %1021 = vmatprep.subr.mxu1 %v400_v39 }
 0x1a0   : > { %1022 = vmatpush3.msra.mxu1 %v400_v39  ;;  %v471_v39 = vld [vmem:[#allocation2 + $0x60] sm:$0xff] }
 0x1a1   : > { %1023 = vmatprep.subr.mxu1 %v980_v36 }
 0x1a2   : > { %1024 = vmatpush3.msra.mxu1 %v980_v36  ;;  %v472_v36 = vld [vmem:[#allocation2 + $0x70] sm:$0xff] }
 0x1a3   : > { %1025 = vmatprep.subr.mxu1 %v390_v37 }
 0x1a4   : > { %1026 = vmatpush3.msra.mxu1 %v390_v37 }
 0x1a5   : > { %1027 = vmatprep.subr.mxu1 %v977_v34 }
 0x1a6   : > { %1028 = vmatpush3.msra.mxu1 %v977_v34 }
 0x1a7   : > { %1029 = vmatprep.subr.mxu1 %v380_v35 }
 0x1a8   : > { %1030 = vmatpush3.msra.mxu1 %v380_v35 }
 0x1a9   : > { %1032 = vmatmul.mubr.f32.vlgmr.msra.gmra.mxu1 %v476_v50 }
 0x1aa   : > { %1034 = vmatprep.mubr.f32.mxu1 %v477_v51 }
 0x1ad   : > { %1035 = vmatmul.mubr.f32.gmra.mxu1 %v478_v52 }
 0x1ae   : > { %1037 = vmatprep.mubr.f32.mxu1 %v479_v53 }
 0x1b1   : > { %1038 = vmatmul.mubr.f32.gmra.mxu1 %v480_v54 }
 0x1b2   : > { %1040 = vmatprep.mubr.f32.mxu1 %v481_v55 }
 0x1b5   : > { %1041 = vmatmul.mubr.f32.gmra.mxu1 %v482_v56 }
 0x1b6   : > { %1043 = vmatprep.mubr.f32.mxu1 %v483_v57 }
 0x1b9   : > { %1044 = vmatmul.mubr.f32.gmra.mxu1 %v484_v58 }
 0x1ba   : > { %1046 = vmatprep.mubr.f32.mxu1 %v485_v59 }
 0x1bd   : > { %1047 = vmatmul.mubr.f32.gmra.mxu1 %v486_v60 }
 0x1be   : > { %1049 = vmatprep.mubr.f32.mxu1 %v487_v61 }
 0x1c1   : > { %1050 = vmatmul.mubr.f32.gmra.mxu1 %v488_v62 }
 0x1c2   : > { %1052 = vmatprep.mubr.f32.mxu1 %v489_v63 }
 0x1c5   : > { %1053 = vmatmul.mubr.f32.gmra.mxu1 %v490_v0 }
 0x269   : > { %v1033_v2 = vpop.f32.mrf.mxu1 }
 0x26a   : > { %v637_v4 = vadd.f32 %v1033_v2, %v460_v1 }
 0x26b   : > { %v557_v5 = vpop.f32.mrf.mxu1 }
 0x26c   : > { %653 = vst [vmem:[#allocation2] sm:$0xff] %v637_v4  ;;  %v636_v7 = vadd.f32 %v557_v5, %v459_v3 }
 0x26d   : > { %v1036_v8 = vpop.f32.mrf.mxu1 }
 0x26e   : > { %652 = vst [vmem:[#allocation2 + $0x30] sm:$0xff] %v636_v7  ;;  %v639_v10 = vadd.f32 %v1036_v8, %v462_v6 }
 0x26f   : > { %v567_v11 = vpop.f32.mrf.mxu1 }
 0x270   : > { %655 = vst [vmem:[#allocation2 + $0x18] sm:$0xff] %v639_v10  ;;  %v638_v13 = vadd.f32 %v567_v11, %v461_v9 }
 0x271   : > { %v1039_v14 = vpop.f32.mrf.mxu1 }
 0x272   : > { %654 = vst [vmem:[#allocation2 + $0x58] sm:$0xff] %v638_v13  ;;  %v641_v16 = vadd.f32 %v1039_v14, %v464_v12 }
 0x273   : > { %v577_v17 = vpop.f32.mrf.mxu1 }
 0x274   : > { %657 = vst [vmem:[#allocation2 + $0x68] sm:$0xff] %v641_v16  ;;  %v640_v19 = vadd.f32 %v577_v17, %v463_v15 }
 0x275   : > { %v1042_v20 = vpop.f32.mrf.mxu1 }
 0x276   : > { %656 = vst [vmem:[#allocation2 + $0x50] sm:$0xff] %v640_v19  ;;  %v643_v22 = vadd.f32 %v1042_v20, %v466_v18 }
 0x277   : > { %v587_v23 = vpop.f32.mrf.mxu1 }
 0x278   : > { %659 = vst [vmem:[#allocation2 + $0x48] sm:$0xff] %v643_v22  ;;  %v642_v25 = vadd.f32 %v587_v23, %v465_v21 }
 0x279   : > { %v1045_v26 = vpop.f32.mrf.mxu1 }
 0x27a   : > { %658 = vst [vmem:[#allocation2 + $0x8] sm:$0xff] %v642_v25  ;;  %v645_v28 = vadd.f32 %v1045_v26, %v468_v24 }
 0x27b   : > { %v597_v29 = vpop.f32.mrf.mxu1 }
 0x27c   : > { %661 = vst [vmem:[#allocation2 + $0x20] sm:$0xff] %v645_v28  ;;  %v644_v31 = vadd.f32 %v597_v29, %v467_v27 }
 0x27d   : > { %v1048_v32 = vpop.f32.mrf.mxu1 }
 0x27e   : > { %660 = vst [vmem:[#allocation2 + $0x40] sm:$0xff] %v644_v31  ;;  %v647_v34 = vadd.f32 %v1048_v32, %v470_v30 }
 0x27f   : > { %v607_v35 = vpop.f32.mrf.mxu1 }
 0x280   : > { %663 = vst [vmem:[#allocation2 + $0x38] sm:$0xff] %v647_v34  ;;  %v646_v37 = vadd.f32 %v607_v35, %v469_v33 }
 0x281   : > { %v1051_v38 = vpop.f32.mrf.mxu1 }
 0x282   : > { %662 = vst [vmem:[#allocation2 + $0x10] sm:$0xff] %v646_v37  ;;  %v649_v40 = vadd.f32 %v1051_v38, %v472_v36 }
 0x283   : > { %v617_v41 = vpop.f32.mrf.mxu1 }
 0x284   : > { %665 = vst [vmem:[#allocation2 + $0x70] sm:$0xff] %v649_v40  ;;  %v648_v43 = vadd.f32 %v617_v41, %v471_v39 }
 0x285   : > { %v1054_v44 = vpop.f32.mrf.mxu1 }
 0x286   : > { %664 = vst [vmem:[#allocation2 + $0x60] sm:$0xff] %v648_v43  ;;  %v651_v46 = vadd.f32 %v1054_v44, %v474_v42  ;;  %671 = sbr.rel (%p870_p1) target bundleno = 662 (0x296), region = 52 }
 0x287   : > { %v627_v47 = vpop.f32.mrf.mxu1 }
 0x288   : > { %667 = vst [vmem:[#allocation2 + $0x28] sm:$0xff] %v651_v46  ;;  %v650_v48 = vadd.f32 %v627_v47, %v473_v45 }
 0x28a   : > { %666 = vst [vmem:[#allocation2 + $0x78] sm:$0xff] %v650_v48 }
 0x28b   : > { %v672_v49 = vld [vmem:[#allocation2 + $0x30] sm:$0xff]  ;;  %v673_v50 = vld [vmem:[#allocation2] sm:$0xff]  ;;  %v674_v51 = vld [vmem:[#allocation2 + $0x58] sm:$0xff] }
 0x28c   : > { %v688_v52 = vmax.f32 %v672_v49, 0.0  ;;  %v689_v53 = vmax.f32 %v673_v50, 0.0  ;;  %v690_v54 = vmax.f32 %v674_v51, 0.0  ;;  %v675_v55 = vld [vmem:[#allocation2 + $0x18] sm:$0xff]  ;;  %v676_v56 = vld [vmem:[#allocation2 + $0x50] sm:$0xff]  ;;  %v677_v57 = vld [vmem:[#allocation2 + $0x68] sm:$0xff] }
 0x28d   : > { %v691_v58 = vmax.f32 %v675_v55, 0.0  ;;  %v692_v59 = vmax.f32 %v676_v56, 0.0  ;;  %v693_v60 = vmax.f32 %v677_v57, 0.0  ;;  %v678_v61 = vld [vmem:[#allocation2 + $0x8] sm:$0xff]  ;;  %v680_v63 = vld [vmem:[#allocation2 + $0x40] sm:$0xff]  ;;  %v682_v4 = vld [vmem:[#allocation2 + $0x10] sm:$0xff] }
 0x28e   : > { %v679_v62 = vld [vmem:[#allocation2 + $0x48] sm:$0xff]  ;;  %704 = vst [vmem:[%s1693_s8] sm:$0xff] %v688_v52  ;;  %705 = vst [vmem:[%s1693_s8 + $0x8] sm:$0xff] %v689_v53  ;;  %v694_v0 = vmax.f32 %v678_v61, 0.0  ;;  %v696_v2 = vmax.f32 %v680_v63, 0.0  ;;  %v681_v3 = vld [vmem:[#allocation2 + $0x20] sm:$0xff]  ;;  %v698_v7 = vmax.f32 %v682_v4, 0.0 }
 0x28f   : > { %706 = vst [vmem:[%s1693_s8 + $0x10] sm:$0xff] %v690_v54  ;;  %v695_v1 = vmax.f32 %v679_v62, 0.0  ;;  %v683_v5 = vld [vmem:[#allocation2 + $0x38] sm:$0xff]  ;;  %707 = vst [vmem:[%s1693_s8 + $0x18] sm:$0xff] %v691_v58  ;;  %v697_v6 = vmax.f32 %v681_v3, 0.0  ;;  %v684_v9 = vld [vmem:[#allocation2 + $0x60] sm:$0xff] }
 0x290   : > { %708 = vst [vmem:[%s1693_s8 + $0x20] sm:$0xff] %v692_v59  ;;  %709 = vst [vmem:[%s1693_s8 + $0x28] sm:$0xff] %v693_v60  ;;  %v699_v8 = vmax.f32 %v683_v5, 0.0  ;;  %v685_v10 = vld [vmem:[#allocation2 + $0x70] sm:$0xff]  ;;  %v700_v12 = vmax.f32 %v684_v9, 0.0  ;;  %v687_v15 = vld [vmem:[#allocation2 + $0x28] sm:$0xff] }
 0x291   : > { %v686_v11 = vld [vmem:[#allocation2 + $0x78] sm:$0xff]  ;;  %710 = vst [vmem:[%s1693_s8 + $0x30] sm:$0xff] %v694_v0  ;;  %711 = vst [vmem:[%s1693_s8 + $0x38] sm:$0xff] %v695_v1  ;;  %v701_v13 = vmax.f32 %v685_v10, 0.0  ;;  %v703_v16 = vmax.f32 %v687_v15, 0.0 }
 0x292   : > { %712 = vst [vmem:[%s1693_s8 + $0x40] sm:$0xff] %v696_v2  ;;  %v702_v14 = vmax.f32 %v686_v11, 0.0  ;;  %713 = vst [vmem:[%s1693_s8 + $0x48] sm:$0xff] %v697_v6 }
 0x293   : > { %714 = vst [vmem:[%s1693_s8 + $0x50] sm:$0xff] %v698_v7  ;;  %715 = vst [vmem:[%s1693_s8 + $0x58] sm:$0xff] %v699_v8 }
 0x294   : > { %716 = vst [vmem:[%s1693_s8 + $0x60] sm:$0xff] %v700_v12  ;;  %717 = vst [vmem:[%s1693_s8 + $0x68] sm:$0xff] %v701_v13 }
 0x295   : > { %718 = vst [vmem:[%s1693_s8 + $0x70] sm:$0xff] %v702_v14  ;;  %719 = vst [vmem:[%s1693_s8 + $0x78] sm:$0xff] %v703_v16 }
 0x296 PF: > { %s1886_s9 = sld [smem:[#allocation17_spill]]  ;;  %s734_s6 = sshll.u32 %s1693_s8, 4  ;;  %s1752_s6 = int_to_ptr.vmem [resolvable:$true] %s734_s6 }
 0x297   : > { %s1888_s3 = sld [smem:[#allocation20_spill]]  ;;  %s1756_s13 = scalar_lea.sflag [#allocation5], %s256_s26 }
 0x298   : > { %s1889_s22 = sld [smem:[#allocation24_spill]]  ;;  %s1285_s29 = scalar_lea.vmem %s1752_s6, 2048 }
 0x299   : > { %p1286_p5 = scmp.ne.s32.totalorder %s1752_s6, %s1285_s29  ;;  %s1446_s27 = smov [#allocation9]  }
 0x29a   : > { %s1289_s18 = sshll.u32 %s1446_s27, 4  ;;  %s1290_s18 = int_to_ptr.vmem [resolvable:$false] %s1289_s18 }
 0x29b   : > { %s1291_s10 = scalar_lea.vmem %s1290_s18, 4096  ;;  %p1292_p9 = scmp.lt.s32.totalorder %s1752_s6, %s1290_s18 }
 0x29c   : > { %s878_s21 = sshll.u32 %s1886_s9, 11  ;;  %p1293_p4 = scmp.lt.s32.totalorder %s1291_s10, %s1285_s29 }
 0x29d   : > { %p1891_p11 = scmp.ne.s32.totalorder %s1888_s3, 0 }
 0x29e   : > { %s1890_s30 = smov %s1889_s22  ;;  %s1749_s4 = scalar_lea.hbm %s1889_s22, %s878_s21 }
 0x29f   : > { %p1287_p0 = pnand %p1286_p5, %p1891_p11  ;;  %p1294_p12 = por %p1293_p4, %p1292_p9 }
 0x2a1   : > { %p1288_p8 = pneg %p1287_p0 }
 0x2a3   : > { %p1295_p6 = pnand %p1294_p12, %p1288_p8 }
 0x2a5   : > { %1298 = shalt.err (!%p1295_p6)
}
 0x2a6   : > { %s1299_s26 = scalar_lea.hbm %s1749_s4, 2048  ;;  %s1303_s2 = scalar_lea.hbm %s1890_s30, 4096 }
 0x2a7   : > { %p1300_p7 = scmp.ne.s32.totalorder %s1749_s4, %s1299_s26  ;;  %p1304_p10 = scmp.lt.s32.totalorder %s1749_s4, %s1890_s30 }
 0x2a8   : > { %p1305_p3 = scmp.lt.s32.totalorder %s1303_s2, %s1299_s26 }
 0x2a9   : > { %p1301_p13 = pnand %p1300_p7, %p1891_p11 }
 0x2aa   : > { %p1306_p1 = por %p1305_p3, %p1304_p10 }
 0x2ab   : > { %p1302_p2 = pneg %p1301_p13 }
 0x2ad   : > { %p1307_p5 = pnand %p1306_p1, %p1302_p2 }
 0x2af   : > { %1310 = shalt.err (!%p1307_p5)
}
 0x2b0   : > { %s1447_s28 = smov 128   ;;  %s1448_s22 = smov 8  }
 0x2b1   : > { %1063 = dma.vmem_to_hbm [thread:$0]  (%p1891_p11), %s1752_s6, 2048, %s1749_s4, %s1756_s13, %s1447_s28, %s1447_s28, %s1448_s22  }
 0x2b2 PF: > { %s1892_s29 = sld [smem:[#allocation14_spill]]  ;;  %p1083_p0 = scmp.ge.s32.totalorder %s1437_s25, 2 }
 0x2b3   : > { %s1893_s27 = sld [smem:[#allocation21_spill]] }
 0x2b8   : > { %s749_s18 = sand.u32 1, %s1892_s29  }
 0x2b9   : > { %p1894_p8 = scmp.ne.s32.totalorder %s1893_s27, 0  ;;  %s750_s10 = scalar_lea.sflag [#allocation5], %s749_s18 }
 0x2bb   : > { %p1077_p9 = pnand %p1083_p0, %p1894_p8 }
 0x2bd   : > { %p1078_p4 = pneg %p1077_p9 }
 0x2bf   : > { %1380 = dma.done.wait (%p1078_p4), %s750_s10, 2048  }
 0x2c0   : > { %1382 = vsyncadd (%p1078_p4), %s750_s10, 4294965248  ;;  %s22_s25 = sadd.s32 1, %s1437_s25   ;;  %s1896_s3 = sld [smem:[#allocation15_spill]] }
 0x2c1   : > { %p1784_p12 = scmp.ge.s32.totalorder %s22_s25, 6   ;;  %s1897_s4 = smov %s1645_s15 }
 0x2c2   : > { %s1898_s6 = smov %s1618_s12  ;;  %s1899_s8 = sld [smem:[#allocation22_spill]] }
 0x2c3   : > { %s1901_s13 = smov %s1393_s14  ;;  %s1902_s14 = smov %s1615_s5 }
 0x2c4   : > { %s1903_s15 = smov %s1401_s16  ;;  %s1904_s16 = smov %s1405_s17 }
 0x2c5   : > { %s1905_s17 = smov %s1897_s4  ;;  %s1906_s18 = smov %s1413_s19 }
 0x2c6   : > { %s1900_s12 = smov %s1896_s3  ;;  %s1907_s19 = smov %s1417_s20 }
 0x2c7   : > { %s1908_s20 = smov %s1898_s6  ;;  %s1909_s21 = smov %s1429_s23 }
 0x2c8   : > { %s1910_s22 = smov %s1433_s24  ;;  %s1911_s23 = smov %s1899_s8 }
 0x2c9   : > { %s1912_s24 = smov %s1918_s7  ;;  %21 = sbr.rel (!%p1784_p12) target bundleno = 15 (0xf), region = 102 }
 0x2ce   :  { %755 = vsyncpa [#allocation4], 1 }
 0x2cf   :  { %757 = vsyncpa [#allocation4 + $0x1], 1 }
 0x2d0   :  { %758 = vsyncpa [#allocation7], 1 }
 0x2d1   :  { %760 = vsyncpa [#allocation7 + $0x1], 1 }
 0x2d2   :  { %761 = vsyncpa [#allocation5], 1 }
 0x2d3   :  { %763 = vsyncpa [#allocation5 + $0x1], 1 }

</bundles_post_ra>
